<compile_context>
chip_gen: v6e
topology: v6e:2x2x1
jax: 0.10.0
libtpu: 0.0.40
codegen_flags: <defaults>
</compile_context>

<pallas_src>
import functools

import jax
import jax.numpy as jnp
from jax.experimental import pallas as pl
from jax.experimental.pallas import tpu as pltpu


def _l2norm_kernel(x_ref, w_ref, o_ref, *, eps):
    # x_ref: (1, C, tile_hw)  -- channels on sublanes, spatial on lanes
    # w_ref: (C, 1)           -- grid-invariant, stays resident in VMEM
    x = x_ref[...].astype(jnp.float32)
    sq_sum = jnp.sum(x * x, axis=1, keepdims=True)          # (1, 1, tile_hw)
    # Reciprocal of the narrow (1,1,tile_hw) norm, then multiply full-width
    # (cheaper than a full-width divide).  approx=False keeps strict f32
    # accuracy; eps is added after the sqrt to match PyTorch exactly.
    inv_norm = pl.reciprocal(jnp.sqrt(sq_sum) + eps, approx=False)
    w = w_ref[...].astype(jnp.float32)[None]                 # (1, C, 1)
    o_ref[...] = (x * inv_norm * w).astype(o_ref.dtype)


def _pick_tile_hw(hw, c, itemsize):
    """Largest lane-dense spatial tile that keeps live block data ~24 MiB.

    Live VMEM blocks = input (double-buffered) + output (double-buffered)
    = 4 copies of C*tile_hw*itemsize, which fits every TPU generation
    (v5e/v6e 128 MiB, v7x 64 MiB per TC) with the 48 MiB scoped limit below.
    """
    max_block_bytes = 6 * 1024 * 1024
    max_tile = max_block_bytes // max(1, c * itemsize)
    max_tile = max(128, (max_tile // 128) * 128)             # lane-dense
    if hw <= max_tile:
        return hw                                            # full extent is always legal
    return max_tile


def l2norm(x_nchw, weight, eps=1e-10):
    """L2Norm forward. x_nchw: (N, C, H, W); weight: (C,)."""
    N, C, H, W = x_nchw.shape
    HW = H * W

    # Free reshapes only -- no data movement outside the kernel.
    x3d = x_nchw.reshape(N, C, HW)
    w2d = weight.reshape(C, 1).astype(x3d.dtype)

    tile_hw = _pick_tile_hw(HW, C, jnp.dtype(x3d.dtype).itemsize)
    grid = (N, pl.cdiv(HW, tile_hw))                         # ragged edge handled by Pallas

    kernel = functools.partial(_l2norm_kernel, eps=eps)

    out3d = pl.pallas_call(
        kernel,
        out_shape=jax.ShapeDtypeStruct((N, C, HW), x3d.dtype),
        grid_spec=pltpu.PrefetchScalarGridSpec(
            num_scalar_prefetch=0,
            grid=grid,
            in_specs=[
                pl.BlockSpec((1, C, tile_hw), lambda n, j: (n, 0, j)),
                pl.BlockSpec((C, 1), lambda n, j: (0, 0)),   # constant index -> stays resident
            ],
            out_specs=pl.BlockSpec((1, C, tile_hw), lambda n, j: (n, 0, j)),
        ),
        compiler_params=pltpu.CompilerParams(
            dimension_semantics=("parallel", "parallel"),
            vmem_limit_bytes=48 * 1024 * 1024,               # safe on v7x (64 MiB/TC), ample on v5e/v6e
        ),
    )(x3d, w2d)

    return out3d.reshape(N, C, H, W)


def l2norm_reference(x_nchw, weight, eps=1e-10):
    norm = jnp.sqrt(jnp.sum(x_nchw * x_nchw, axis=1, keepdims=True)) + eps
    return weight.reshape(1, -1, 1, 1) * (x_nchw / norm)


if __name__ == "__main__":
    # Module config: L2Norm(n_channels=4, scale=10.0)
    n_channels = 4
    scale = 10.0

    # init.constant_(weight, gamma)
    weight = jnp.full((n_channels,), scale, dtype=jnp.float32)

    key = jax.random.PRNGKey(0)
    x = jax.random.normal(key, (2, n_channels, 16, 16), dtype=jnp.float32)

    out = l2norm(x, weight)
    out = jax.block_until_ready(out)

    ref = l2norm_reference(x, weight)
    assert out.shape == x.shape
    assert jnp.allclose(out, ref, atol=1e-5, rtol=1e-5)

    print("KERNEL_OK")
</pallas_src>

<mosaic_0001>
module attributes {stable_mosaic.version = 11 : i64} {
  func.func @_l2norm_kernel(%arg0: i32, %arg1: i32, %arg2: memref<1x4x256xf32, #tpu.memory_space<vmem>>, %arg3: memref<4x1xf32, #tpu.memory_space<vmem>>, %arg4: memref<1x4x256xf32, #tpu.memory_space<vmem>>) attributes {dimension_semantics = [#tpu.dimension_semantics<parallel>, #tpu.dimension_semantics<parallel>], iteration_bounds = array<i64: 2, 1>, scalar_prefetch = 0 : i64, scratch_operands = 0 : i64, tpu.core_type = #tpu.core_type<tc>, window_params = [{transform_indices = @transform_0, window_bounds = array<i64: 1, 4, 256>}, {pipeline_mode = #tpu.pipeline_mode<synchronous>, transform_indices = @transform_1, window_bounds = array<i64: 4, 1>}, {transform_indices = @transform_2, window_bounds = array<i64: 1, 4, 256>}]} {
    %c0 = arith.constant 0 : index
    %c0_0 = arith.constant 0 : index
    %c0_1 = arith.constant 0 : index
    %0 = vector.load %arg2[%c0, %c0_0, %c0_1] : memref<1x4x256xf32, #tpu.memory_space<vmem>>, vector<1x4x256xf32>
    %1 = arith.mulf %0, %0 : vector<1x4x256xf32>
    %cst = arith.constant dense<0.000000e+00> : vector<1x256xf32>
    %2 = vector.multi_reduction <add>, %1, %cst [1] : vector<1x4x256xf32> to vector<1x256xf32>
    %3 = vector.shape_cast %2 : vector<1x256xf32> to vector<1x1x256xf32>
    %4 = math.sqrt %3 : vector<1x1x256xf32>
    %cst_2 = arith.constant 1.000000e-10 : f32
    %5 = vector.broadcast %cst_2 : f32 to vector<1x1x256xf32>
    %6 = arith.addf %4, %5 : vector<1x1x256xf32>
    %7 = tpu.reciprocal %6 : vector<1x1x256xf32> -> vector<1x1x256xf32>
    %c0_3 = arith.constant 0 : index
    %c0_4 = arith.constant 0 : index
    %8 = vector.load %arg3[%c0_3, %c0_4] : memref<4x1xf32, #tpu.memory_space<vmem>>, vector<4x1xf32>
    %9 = vector.shape_cast %8 : vector<4x1xf32> to vector<1x4x1xf32>
    %10 = vector.broadcast %7 : vector<1x1x256xf32> to vector<1x4x256xf32>
    %11 = arith.mulf %0, %10 : vector<1x4x256xf32>
    %12 = vector.broadcast %9 : vector<1x4x1xf32> to vector<1x4x256xf32>
    %13 = arith.mulf %11, %12 : vector<1x4x256xf32>
    %c0_5 = arith.constant 0 : index
    %c0_6 = arith.constant 0 : index
    %c0_7 = arith.constant 0 : index
    %14 = vector.load %arg4[%c0_5, %c0_6, %c0_7] : memref<1x4x256xf32, #tpu.memory_space<vmem>>, vector<1x4x256xf32>
    tpu.vector_store %arg4[%c0_5, %c0_6, %c0_7], %13 {strides = array<i32>} : memref<1x4x256xf32, #tpu.memory_space<vmem>>, vector<1x4x256xf32>,
    return
  }
  func.func @transform_0(%arg0: i32, %arg1: i32) -> (i32, i32, i32) {
    %c0_i32 = arith.constant 0 : i32
    %c0_i32_0 = arith.constant 0 : i32
    return %arg0, %c0_i32, %arg1 : i32, i32, i32
  }
  func.func @transform_1(%arg0: i32, %arg1: i32) -> (i32, i32) {
    %c0_i32 = arith.constant 0 : i32
    %c0_i32_0 = arith.constant 0 : i32
    %c0_i32_1 = arith.constant 0 : i32
    return %c0_i32, %c0_i32_0 : i32, i32
  }
  func.func @transform_2(%arg0: i32, %arg1: i32) -> (i32, i32, i32) {
    %c0_i32 = arith.constant 0 : i32
    %c0_i32_0 = arith.constant 0 : i32
    return %arg0, %c0_i32, %arg1 : i32, i32, i32
  }
}

</mosaic_0001>

<bundles_post_ra>
// kernel: tpu_custom_call.1
= control target key start
LH: loop header
LB: loop body
LE: loop exit
PB: predicated region body
PF: predicated region fallthrough
CT: control target
= control target key end

     0   :  { %7 = vsyncpa [#allocation3], 0  ;;  %s699_s0 = inlined_call_operand.hbm [shape: f32[2,4,256], index: 0, kind: input, shape index: {}]   ;;  %s700_s1 = inlined_call_operand.vmem [shape: f32[4,1], index: 1, kind: input, shape index: {}]   ;;  %s701_s2 = inlined_call_operand.hbm [shape: f32[2,4,256], index: 2, kind: output, shape index: {}]  }
   0x1   :  { %9 = vsyncpa [#allocation3 + $0x1], 0 }
   0x2   :  { %10 = vsyncpa [#allocation4], 0 }
   0x3   :  { %12 = vsyncpa [#allocation4 + $0x1], 0  ;;  %s558_s9 = smov 0   ;;  %s560_s10 = smov 0  }
   0x4   :  { %s562_s11 = smov 0   ;;  %s564_s12 = smov 0  }
   0x5   :  { %s566_s13 = smov 0   ;;  %s568_s14 = smov 0  }
   0x6 LB: > { %s339_s15 = sadd.s32 4294967295, %s537_s14   ;;  %s340_s16 = sadd.s32 4294967294, %s537_s14   ;;  %s537_s14 = sphi %s568_s14, %s18_s14   ;;  %s533_s13 = sphi %s566_s13, %s713_s13   ;;  %s529_s12 = sphi %s564_s12, %s712_s12   ;;  %s525_s11 = sphi %s562_s11, %s711_s11   ;;  %s521_s10 = sphi %s560_s10, %s710_s10   ;;  %s517_s9 = sphi %s558_s9, %s709_s9  }
   0x7   : > { %s30_s17 = sadd.s32 1, %s533_s13  ;;  %s39_s18 = sadd.s32 1, %s525_s11 }
   0x8   : > { %p32_p0 = scmp.ge.s32.totalorder %s30_s17, 2  ;;  %p46_p1 = scmp.ne.s32.totalorder %s525_s11, %s521_s10 }
   0x9   : > { %p47_p2 = scmp.eq.s32.totalorder %s537_s14, 0  ;;  %p52_p3 = scmp.ne.s32.totalorder %s521_s10, %s517_s9 }
   0xa   : > { %s715_s17 = smov (%p32_p0, %s30_s17), 0  ;;  %p53_p5 = scmp.eq.s32.totalorder %s339_s15, 0 }
   0xb   : > { %p599_p4 = por %p47_p2, %p46_p1  ;;  %s34_s20 = ssub.s32 %s533_s13, %s715_s17 }
   0xc   : > { %p99_p6 = scmp.eq.s32.totalorder %s339_s15, 1  ;;  %p37_p7 = scmp.eq.s32.totalorder %s34_s20, 0 }
   0xd   : > { %p605_p8 = por %p53_p5, %p52_p3  ;;  %p105_p10 = scmp.eq.s32.totalorder %s340_s16, 1 }
   0xe   : > { %p609_p9 = por %p99_p6, %p46_p1  ;;  %p368_p13 = scmp.lt.s32.totalorder %s537_s14, 2 }
   0xf   : > { %s614_s23 = scalar_select %p37_p7, %s525_s11, %s39_s18  }
  0x10   : > { %p616_p11 = por %p105_p10, %p52_p3  ;;  %s128_s25 = sand.u32 1, %s525_s11  }
  0x11   : > { %s343_s26 = sshll.u32 %s128_s25, 3  ;;  %s354_s27 = sshll.u32 %s533_s13, 7 }
  0x12   : > { %s705_s24 = scalar_select %p616_p11, 1, 0 }
  0x13   : > { %s140_s30 = scalar_lea.hbm %s699_s0, %s354_s27  ;;  %s132_s3 = scalar_lea.vmem [#allocation2], %s343_s26 }
  0x14   : > { %s142_s4 = sshll.u32 %s132_s3, 4  ;;  %p629_p0 = pnand %p368_p13, %p599_p4  ;;  %s143_s4 = int_to_ptr.vmem [resolvable:$true] %s142_s4 }
  0x15   : > { %p346_p1 = scmp.ge.s32.totalorder %s537_s14, 1  ;;  %p147_p2 = scmp.lt.s32.totalorder %s537_s14, 3 }
  0x16   : > { %s129_s6 = scalar_lea.sflag [#allocation3], %s128_s25  ;;  %p431_p3 = pneg %p629_p0 }
  0x17   : > { %s442_s7 = scalar_lea.vmem %s143_s4, 128  ;;  %s539_s8 = smov [#allocation2]  }
  0x18   : > { %p443_p5 = scmp.ne.s32.totalorder %s143_s4, %s442_s7  ;;  %s447_s15 = sshll.u32 %s539_s8, 4  ;;  %s448_s15 = int_to_ptr.vmem [resolvable:$false] %s447_s15 }
  0x19   : > { %s449_s16 = scalar_lea.vmem %s448_s15, 256  ;;  %p450_p10 = scmp.lt.s32.totalorder %s143_s4, %s448_s15 }
  0x1a   : > { %p445_p6 = pnand %p443_p5, %p431_p3  ;;  %p451_p12 = scmp.lt.s32.totalorder %s449_s16, %s442_s7 }
  0x1c   : > { %p446_p7 = pneg %p445_p6  ;;  %p452_p4 = por %p451_p12, %p450_p10 }
  0x1e   : > { %p453_p13 = pnand %p452_p4, %p446_p7 }
  0x20   : > { %456 = shalt.err (!%p453_p13)
}
  0x21   : > { %363 = dma.hbm_to_vmem [thread:$0]  (!%p629_p0), %s140_s30, 128, %s143_s4, %s129_s6  }
  0x22   : > { %p148_p11 = pnand %p346_p1, %p147_p2 }
  0x23   : > { %s644_s18 = sand.u32 (!%p148_p11), 1, %s521_s10  }
  0x24   : > { %151 = sbr.rel (%p148_p11) target bundleno = 185 (0xb9), region = 28  ;;  %s347_s19 = sshll.u32 (!%p148_p11), %s644_s18, 3 }
  0x25   : > { %s154_s20 = scalar_lea.sflag (!%p148_p11), [#allocation3], %s644_s18  ;;  %s157_s25 = scalar_lea.vmem (!%p148_p11), [#allocation2], %s347_s19 }
  0x29   : > { %508 = dma.done.wait (%p605_p8), %s154_s20, 128  }
  0x2a   : > { %510 = vsyncadd (%p605_p8), %s154_s20, 4294967168  ;;  %v540_v0 = vmov 0   ;;  %v218_v1 = vld [vmem:[%s700_s1] sm:$0xf]  ;;  %vm185_vm0 = vcmask 1043456   ;;  %v231_v33 = vlaneseq  ;;  %s355_s21 = sshll.u32 %s529_s12, 7 }
  0x2b   : > { %420 = vset.pattern.permute.xlu0 %v540_v0  ;;  %v180_v2 = vld [vmem:[%s157_s25] sm:$0xff]  ;;  %v541_v31 = vmov 839922192   ;;  %s177_s28 = scalar_lea.vmem [#allocation5], %s347_s19  ;;  %s253_s4 = scalar_lea.hbm %s701_s2, %s355_s21 }
  0x2c   : > { %226 = vperm.xlu0 %420, %v218_v1   ;;  %v181_v3 = vmul.f32 %v180_v2, %v180_v2  ;;  %v229_v32 = vunpack.c.l.s4 %v541_v31  ;;  %v232_v37 = vshrl.u32 %v231_v33, 7  ;;  %s255_s29 = sshll.u32 %s177_s28, 4  ;;  %s239_s5 = scalar_lea.sflag [#allocation4], %s644_s18  ;;  %s256_s29 = int_to_ptr.vmem [resolvable:$true] %s255_s29 }
  0x2d   : > { %s457_s6 = scalar_lea.vmem %s256_s29, 128  ;;  %s542_s7 = smov [#allocation5]  }
  0x2e   : > { %v183_v4 = vcombine.high %v181_v3, %v181_v3  ;;  %v186_v5 = vsel %vm185_vm0, %v181_v3, 0.0  ;;  %v230_v36 = vunpack.c.0.s8 %v229_v32  ;;  %p458_p8 = scmp.ne.s32.totalorder %s256_s29, %s457_s6  ;;  %s461_s8 = sshll.u32 %s542_s7, 4  ;;  %s462_s8 = int_to_ptr.vmem [resolvable:$false] %s461_s8 }
  0x2f   : > { %v187_v7 = vrot.slane %v186_v5, 4  ;;  %s463_s12 = scalar_lea.vmem %s462_s8, 256  ;;  %p464_p0 = scmp.lt.s32.totalorder %s256_s29, %s462_s8 }
  0x30   : > { %v193_v6 = vsel %vm185_vm0, %v183_v4, 0.0  ;;  %v233_v39 = vsub.s32 %v230_v36, %v232_v37  ;;  %p459_p11 = pnand %p458_p8, %p609_p9  ;;  %p465_p1 = scmp.lt.s32.totalorder %s463_s12, %s457_s6 }
  0x31   : > { %v194_v8 = vrot.slane %v193_v6, 4  ;;  %v188_v9 = vadd.f32 %v187_v7, %v186_v5 }
  0x32   : > { %p460_p12 = pneg %p459_p11  ;;  %p466_p2 = por %p465_p1, %p464_p0 }
  0x33   : > { %v195_v10 = vadd.f32 %v194_v8, %v193_v6  ;;  %v189_v11 = vrot.slane %v188_v9, 2 }
  0x34   : > { %p467_p3 = pnand %p466_p2, %p460_p12 }
  0x35   : > { %v196_v12 = vrot.slane %v195_v10, 2  ;;  %v190_v13 = vadd.f32 %v189_v11, %v188_v9 }
  0x37   : > { %v197_v14 = vadd.f32 %v196_v12, %v195_v10  ;;  %v191_v15 = vrot.slane %v190_v13, 1 }
  0x39   : > { %v198_v16 = vrot.slane %v197_v14, 1  ;;  %v192_v17 = vadd.f32 %v191_v15, %v190_v13 }
  0x3b   : > { %v199_v18 = vadd.f32 %v198_v16, %v197_v14  ;;  %421 = vrsqrt.f32 %v192_v17  ;;  %vm202_vm1 = vcmp.eq.f32.partialorder %v192_v17, inf  ;;  %v205_v23 = vand.u32 2147483648, %v192_v17 }
  0x3c   : > { %vm204_vm3 = vcmp.eq.f32.partialorder %v192_v17, 0.0 }
  0x3d   : > { %423 = vrsqrt.f32 %v199_v18  ;;  %vm209_vm2 = vcmp.eq.f32.partialorder %v199_v18, inf  ;;  %v212_v25 = vand.u32 2147483648, %v199_v18  ;;  %vm211_vm4 = vcmp.eq.f32.partialorder %v199_v18, 0.0 }
  0x48   : > { %v422_v19 = vpop.eup %421 }
  0x49   : > { %v201_v21 = vmul.f32 %v422_v19, %v192_v17 }
  0x4a   : > { %v424_v20 = vpop.eup %423 }
  0x4b   : > { %v208_v22 = vmul.f32 %v424_v20, %v199_v18  ;;  %v203_v24 = vsel %vm202_vm1, %v192_v17, %v201_v21 }
  0x4c   : > { %v206_v27 = vsel %vm204_vm3, %v205_v23, %v203_v24 }
  0x4d   : > { %v210_v26 = vsel %vm209_vm2, %v199_v18, %v208_v22  ;;  %v214_v29 = vadd.f32 1e-10, %v206_v27 }
  0x4e   : > { %v213_v28 = vsel %vm211_vm4, %v212_v25, %v210_v26 }
  0x4f   : > { %v215_v30 = vadd.f32 1e-10, %v213_v28  ;;  %425 = vrcp.f32 %v214_v29 }
  0x51   : > { %427 = vrcp.f32 %v215_v30 }
  0x5c   : > { %v426_v34 = vpop.eup %425 }
  0x5e   : > { %v428_v35 = vpop.eup %427 }
  0x5f   : > { %v221_v38 = vcombine.low %v426_v34, %v428_v35 }
  0x61   : > { %v223_v40 = vmul.f32 %v221_v38, %v180_v2 }
  0xa7   : > { %v227_v41 = vpop.permute.xlu0 %226 }
  0xa8   : > { %v234_v42 = vrot.slane %v227_v41, %v233_v39 }
  0xaa   : > { %v236_v43 = vmul.f32 %v234_v42, %v223_v40 }
  0xac   : > { %237 = vst [vmem:[%s177_s28] sm:$0xff] %v236_v43 }
  0xad   : > { %470 = shalt.err (!%p467_p3)
}
  0xae   : > { %s471_s15 = scalar_lea.hbm %s253_s4, 128  ;;  %s475_s19 = scalar_lea.hbm %s701_s2, 256 }
  0xaf   : > { %p472_p5 = scmp.ne.s32.totalorder %s253_s4, %s471_s15  ;;  %p476_p10 = scmp.lt.s32.totalorder %s253_s4, %s701_s2 }
  0xb0   : > { %p477_p4 = scmp.lt.s32.totalorder %s475_s19, %s471_s15 }
  0xb1   : > { %p473_p6 = pnand %p472_p5, %p609_p9 }
  0xb2   : > { %p478_p13 = por %p477_p4, %p476_p10 }
  0xb3   : > { %p474_p7 = pneg %p473_p6 }
  0xb5   : > { %p479_p8 = pnand %p478_p13, %p474_p7 }
  0xb7   : > { %482 = shalt.err (!%p479_p8)
}
  0xb8   : > { %358 = dma.vmem_to_hbm [thread:$0]  (%p609_p9), %s256_s29, 128, %s253_s4, %s239_s5  }
  0xb9 PF: > { %s267_s26 = sand.u32 1, %s517_s9   ;;  %p707_p11 = scmp.ne.s32.totalorder %s705_s24, 0 }
  0xba   : > { %p708_p12 = scmp.ge.s32.totalorder %s537_s14, 2  ;;  %s268_s27 = scalar_lea.sflag [#allocation4], %s267_s26 }
  0xbc   : > { %p365_p0 = pnand %p708_p12, %p707_p11 }
  0xbe   : > { %p366_p1 = pneg %p365_p0 }
  0xc0   : > { %512 = dma.done.wait (%p366_p1), %s268_s27, 128  }
  0xc1   : > { %514 = vsyncadd (%p366_p1), %s268_s27, 4294967168  ;;  %s18_s14 = sadd.s32 1, %s537_s14   ;;  %s709_s9 = smov %s521_s10 }
  0xc2   : > { %p15_p2 = scmp.ge.s32.totalorder %s18_s14, 4   ;;  %s710_s10 = smov %s525_s11 }
  0xc3   : > { %s711_s11 = smov %s614_s23  ;;  %s712_s12 = smov %s533_s13 }
  0xc4   : > { %s713_s13 = smov %s715_s17  ;;  %17 = sbr.rel (!%p15_p2) target bundleno = 6 (0x6), region = 73 }
  0xc9   :  { %273 = vsyncpa [#allocation3], 1 }
  0xca   :  { %275 = vsyncpa [#allocation3 + $0x1], 1 }
  0xcb   :  { %276 = vsyncpa [#allocation4], 1 }
  0xcc   :  { %278 = vsyncpa [#allocation4 + $0x1], 1 }

</bundles_post_ra>
